<compile_context>
chip_gen: v7x
topology: tpu7x:2x2x1
jax: 0.10.0
libtpu: 0.0.40
codegen_flags: <defaults>
</compile_context>

<pallas_src>
import functools

import jax
import jax.numpy as jnp
from jax.experimental import pallas as pl
from jax.experimental.pallas import tpu as pltpu


def _nconv_kernel(a_ref, x_ref, o_ref, *, precision):
    # a_ref: (V, W) resident; x_ref: (Bb, W, L); o_ref: (Bb, V, L)
    bb = x_ref.shape[0]
    a_b = jnp.broadcast_to(a_ref[...], (bb,) + a_ref.shape)  # (Bb, V, W)
    o_ref[...] = jnp.einsum(
        "bvw,bwl->bvl",
        a_b,
        x_ref[...],
        preferred_element_type=jnp.float32,
        precision=precision,
    ).astype(o_ref.dtype)


def _choose_block_b(B, W, L, V, in_itemsize, out_itemsize, vmem_budget_bytes):
    """Batch tile sized from a conservative VMEM budget.

    Accounts for double-buffered x/out blocks, the in-kernel f32 broadcast of A
    and the f32 einsum result before the down-cast store.
    """
    per_b = (
        2 * W * L * in_itemsize      # x block (double buffered)
        + 2 * V * L * out_itemsize   # out block (double buffered)
        + V * W * 4                  # broadcast A (f32-ish upper bound)
        + V * L * 4                  # f32 result before astype
    )
    bb = max(1, int(vmem_budget_bytes // max(per_b, 1)))
    # Keep >= 2 grid steps so the "parallel" axis can split across v7x's two
    # TensorCores and the DMA pipeline has steps to overlap.
    if B >= 2:
        bb = min(bb, (B + 1) // 2)
    return int(min(bb, B))


def nconv(x, A, *, out_dtype=None, block_b=None, precision=None,
          vmem_budget_bytes=10 * 1024 * 1024):
    """einsum('ncwl,vw->ncvl') as a single Pallas TPU call.

    x: (N, C, W, L), A: (V, W) -> (N, C, V, L).

    For the low-HBM-traffic path, pass bf16 x/A: the kernel reads bf16,
    accumulates in f32 on the MXU, and (with out_dtype=None) writes bf16.
    Pass precision=jax.lax.Precision.HIGHEST for bit-parity with f32 PyTorch.
    """
    N, C, W, L = x.shape
    V, W2 = A.shape
    if W != W2:
        raise ValueError(f"contraction dims must match: x has W={W}, A has W={W2}")
    if out_dtype is None:
        out_dtype = x.dtype

    B = N * C
    x3d = x.reshape(B, W, L)  # free reshape: no HBM copy, layout preserved

    in_itemsize = jnp.dtype(x.dtype).itemsize
    out_itemsize = jnp.dtype(out_dtype).itemsize
    if block_b is None:
        block_b = _choose_block_b(B, W, L, V, in_itemsize, out_itemsize,
                                  vmem_budget_bytes)
    block_b = int(max(1, min(block_b, B)))
    grid = (pl.cdiv(B, block_b),)  # ragged tail handled by Pallas masking

    cost = pl.CostEstimate(
        flops=2 * B * V * W * L,
        transcendentals=0,
        bytes_accessed=(B * W * L + V * W) * in_itemsize
        + B * V * L * out_itemsize,
    )

    kernel = functools.partial(_nconv_kernel, precision=precision)

    out3d = pl.pallas_call(
        kernel,
        out_shape=jax.ShapeDtypeStruct((B, V, L), out_dtype),
        grid_spec=pltpu.PrefetchScalarGridSpec(
            num_scalar_prefetch=0,
            grid=grid,
            in_specs=[
                pl.BlockSpec((V, W), lambda b: (0, 0)),              # A: resident
                pl.BlockSpec((block_b, W, L), lambda b: (b, 0, 0)),  # x slab
            ],
            out_specs=pl.BlockSpec((block_b, V, L), lambda b: (b, 0, 0)),
        ),
        compiler_params=pltpu.CompilerParams(
            dimension_semantics=("parallel",),
        ),
        cost_estimate=cost,
    )(A, x3d)

    # (B, V, L) -> (N, C, V, L): free reshape, no HBM copy.
    return out3d.reshape(N, C, V, L)


if __name__ == "__main__":
    key = jax.random.PRNGKey(0)
    kx, ka = jax.random.split(key)

    # Small shapes consistent with MTGNN's nconv usage:
    # batch N=2, channels C=4, nodes W=16 (adjacency V=W=16), seq L=16.
    N, C, W, L, V = 2, 4, 16, 16, 16
    x = jax.random.normal(kx, (N, C, W, L), dtype=jnp.float32)
    A = jax.random.normal(ka, (V, W), dtype=jnp.float32)

    ref = jnp.einsum("ncwl,vw->ncvl", x, A)

    # f32 path (semantics of the PyTorch module).
    out = jax.block_until_ready(nconv(x, A))
    assert out.shape == (N, C, V, L)
    assert out.dtype == x.dtype
    assert jnp.allclose(out, ref, atol=1e-4, rtol=1e-4), "mismatch vs einsum reference"

    # Low-traffic path: bf16 inputs AND bf16 output (halves read + write HBM
    # traffic on this bandwidth-bound op).
    out_bf16 = jax.block_until_ready(
        nconv(x.astype(jnp.bfloat16), A.astype(jnp.bfloat16))
    )
    assert out_bf16.shape == (N, C, V, L)
    assert out_bf16.dtype == jnp.bfloat16
    assert jnp.allclose(out_bf16.astype(jnp.float32), ref, atol=2e-1, rtol=2e-1), (
        "bf16 path mismatch"
    )

    print("KERNEL_OK")
</pallas_src>

<mosaic_0001>
module attributes {stable_mosaic.version = 11 : i64} {
  func.func @_nconv_kernel(%arg0: i32, %arg1: memref<16x16xf32, #tpu.memory_space<vmem>>, %arg2: memref<4x16x16xf32, #tpu.memory_space<vmem>>, %arg3: memref<4x16x16xf32, #tpu.memory_space<vmem>>) attributes {dimension_semantics = [#tpu.dimension_semantics<parallel>], iteration_bounds = array<i64: 2>, scalar_prefetch = 0 : i64, scratch_operands = 0 : i64, tpu.core_type = #tpu.core_type<tc>, window_params = [{pipeline_mode = #tpu.pipeline_mode<synchronous>, transform_indices = @transform_0, window_bounds = array<i64: 16, 16>}, {transform_indices = @transform_1, window_bounds = array<i64: 4, 16, 16>}, {transform_indices = @transform_2, window_bounds = array<i64: 4, 16, 16>}]} {
    %c0 = arith.constant 0 : index
    %c0_0 = arith.constant 0 : index
    %0 = vector.load %arg1[%c0, %c0_0] : memref<16x16xf32, #tpu.memory_space<vmem>>, vector<16x16xf32>
    %1 = vector.shape_cast %0 : vector<16x16xf32> to vector<1x16x16xf32>
    %2 = vector.broadcast %1 : vector<1x16x16xf32> to vector<4x16x16xf32>
    %c0_1 = arith.constant 0 : index
    %c0_2 = arith.constant 0 : index
    %c0_3 = arith.constant 0 : index
    %3 = vector.load %arg2[%c0_1, %c0_2, %c0_3] : memref<4x16x16xf32, #tpu.memory_space<vmem>>, vector<4x16x16xf32>
    "tpu.trace_start"() <{level = 10 : i32, message = "bvw,bwl->bvl"}> : () -> ()
    %cst = arith.constant dense<0.000000e+00> : vector<4x16x16xf32>
    %4 = tpu.matmul %2, %3, %cst {dimension_numbers = #tpu.dot_dimension_numbers<[2], [1], [1], [2], [0, 0, 0, 1, 1, 2], [0], [0]>} : vector<4x16x16xf32>, vector<4x16x16xf32>, vector<4x16x16xf32> -> vector<4x16x16xf32>
    "tpu.trace_stop"() : () -> ()
    %c0_4 = arith.constant 0 : index
    %c0_5 = arith.constant 0 : index
    %c0_6 = arith.constant 0 : index
    %5 = vector.load %arg3[%c0_4, %c0_5, %c0_6] : memref<4x16x16xf32, #tpu.memory_space<vmem>>, vector<4x16x16xf32>
    tpu.vector_store %arg3[%c0_4, %c0_5, %c0_6], %4 {strides = array<i32>} : memref<4x16x16xf32, #tpu.memory_space<vmem>>, vector<4x16x16xf32>,
    return
  }
  func.func @transform_0(%arg0: i32) -> (i32, i32) {
    %c0_i32 = arith.constant 0 : i32
    %c0_i32_0 = arith.constant 0 : i32
    %c0_i32_1 = arith.constant 0 : i32
    return %c0_i32, %c0_i32_0 : i32, i32
  }
  func.func @transform_1(%arg0: i32) -> (i32, i32, i32) {
    %c0_i32 = arith.constant 0 : i32
    %c0_i32_0 = arith.constant 0 : i32
    %c0_i32_1 = arith.constant 0 : i32
    return %arg0, %c0_i32, %c0_i32_0 : i32, i32, i32
  }
  func.func @transform_2(%arg0: i32) -> (i32, i32, i32) {
    %c0_i32 = arith.constant 0 : i32
    %c0_i32_0 = arith.constant 0 : i32
    %c0_i32_1 = arith.constant 0 : i32
    return %arg0, %c0_i32, %c0_i32_0 : i32, i32, i32
  }
}

</mosaic_0001>

<bundles_post_ra>
// kernel: tpu_custom_call.1
= control target key start
LH: loop header
LB: loop body
LE: loop exit
PB: predicated region body
PF: predicated region fallthrough
CT: control target
= control target key end

     0   :  { %7 = vsyncpa [#allocation3], 0  ;;  %s1135_s0 = inlined_call_operand.hbm [shape: f32[16,16], index: 0, kind: input, shape index: {}]   ;;  %s1136_s1 = inlined_call_operand.hbm [shape: f32[8,16,16], index: 1, kind: input, shape index: {}]   ;;  %s1137_s2 = inlined_call_operand.hbm [shape: f32[8,16,16], index: 2, kind: output, shape index: {}]  }
   0x1   :  { %8 = vsyncpa [#allocation6], 0 }
   0x2   :  { %10 = vsyncpa [#allocation6 + $0x1], 0 }
   0x3   :  { %11 = vsyncpa [#allocation4], 0 }
   0x4   :  { %13 = vsyncpa [#allocation4 + $0x1], 0  ;;  %s908_s9 = smov 0   ;;  %s910_s10 = smov 0  }
   0x5   :  { %s912_s11 = smov 0   ;;  %s914_s12 = smov 0  }
   0x6 LB: > { %s929_s13 = sadd.s32 4294967295, %s884_s12   ;;  %s605_s14 = sadd.s32 4294967294, %s884_s12   ;;  %s884_s12 = sphi %s914_s12, %s1157_s12   ;;  %s880_s11 = sphi %s912_s11, %s1156_s11   ;;  %s876_s10 = sphi %s910_s10, %s1155_s10   ;;  %s872_s9 = sphi %s908_s9, %s1154_s9  }
   0x7   : > { %p60_p0 = scmp.ne.s32.totalorder %s876_s10, %s872_s9  ;;  %p1138_p1 = scmp.eq.s32.totalorder %s929_s13, 0 }
   0x8   : > { %p90_p3 = scmp.eq.s32.totalorder %s605_s14, 1  ;;  %p606_p5 = scmp.ge.s32.totalorder %s884_s12, 1 }
   0x9   : > { %p938_p4 = por %p1138_p1, %p60_p0  ;;  %p97_p7 = scmp.lt.s32.totalorder %s884_s12, 3 }
   0xa   : > { %p943_p6 = por %p90_p3, %p60_p0  ;;  %s886_s18 = smov [#allocation2]  }
   0xb   : > { %s1141_s15 = scalar_select %p938_p4, 1, 0 }
   0xc   : > { %s1142_s16 = scalar_select %p943_p6, 1, 0 }
   0xd   : > { %p948_p8 = pnand %p606_p5, %p97_p7  ;;  %s109_s19 = sshll.u32 %s886_s18, 4  ;;  %s952_s19 = int_to_ptr.vmem [resolvable:$true] %s109_s19 }
   0xe   : > { %s964_s21 = sadd.s32 1, %s884_s12   ;;  %s47_s22 = sadd.s32 1, %s880_s11 }
   0xf   : > { %s1143_s17 = scalar_select %p948_p8, 1, 0 }
  0x10   : > { %p703_p9 = pneg %p948_p8  ;;  %s44_s23 = ssub.s32 %s884_s12, %s964_s21 }
  0x11   : > { %s756_s26 = scalar_lea.hbm %s1135_s0, 256 }
  0x12   : > { %p959_p11 = pnand %p703_p9, %p1138_p1  ;;  %p757_p12 = scmp.ne.s32.totalorder %s1135_s0, %s756_s26 }
  0x13   : > { %p763_p5 = scmp.lt.u32.totalorder %s756_s26, %s1135_s0 }
  0x14   : > { %p758_p13 = pneg %p959_p11 }
  0x16   : > { %p759_p0 = pnand %p758_p13, %p757_p12 }
  0x18   : > { %p760_p3 = pneg %p759_p0 }
  0x1a   : > { %p765_p7 = pnand %p763_p5, %p760_p3 }
  0x1c   : > { %768 = shalt.err (!%p765_p7)
}
  0x1d   : > { %s769_s3 = scalar_lea.vmem %s952_s19, 256  ;;  %p777_p2 = scmp.lt.s32.totalorder %s952_s19, %s952_s19 }
  0x1e   : > { %p770_p9 = scmp.ne.s32.totalorder %s952_s19, %s769_s3  ;;  %p778_p6 = scmp.lt.s32.totalorder %s769_s3, %s769_s3 }
  0x20   : > { %p772_p10 = pnand %p770_p9, %p758_p13  ;;  %p779_p4 = por %p778_p6, %p777_p2 }
  0x22   : > { %p773_p1 = pneg %p772_p10 }
  0x24   : > { %p780_p8 = pnand %p779_p4, %p773_p1 }
  0x26   : > { %783 = shalt.err (!%p780_p8)
}
  0x27   : > { %s887_s4 = smov 128   ;;  %s888_s5 = smov 8  }
  0x28   : > { %706 = dma.hbm_to_vmem [thread:$0]  (!%p959_p11), %s1135_s0, 256, %s952_s19, [#allocation3], %s887_s4, %s887_s4, %s888_s5  }
  0x29   : > { %p45_p1 = scmp.eq.s32.totalorder %s44_s23, 0  ;;  %p54_p2 = scmp.ne.s32.totalorder %s880_s11, %s876_s10 }
  0x2a   : > { %p55_p4 = scmp.eq.s32.totalorder %s884_s12, 0  ;;  %p716_p6 = scmp.lt.s32.totalorder %s884_s12, 2 }
  0x2b   : > { %s998_s8 = scalar_select %p45_p1, %s880_s11, %s47_s22  }
  0x2c   : > { %p56_p8 = por %p55_p4, %p54_p2  ;;  %p1145_p10 = scmp.eq.s32.totalorder %s929_s13, 1 }
  0x2d   : > { %s123_s18 = sand.u32 1, %s880_s11   ;;  %s632_s20 = sshll.u32 %s884_s12, 10 }
  0x2e   : > { %p1002_p12 = por %p1145_p10, %p54_p2  ;;  %s609_s24 = sshll.u32 %s123_s18, 6 }
  0x2f   : > { %s1011_s27 = scalar_lea.hbm %s1136_s1, %s632_s20  ;;  %s127_s19 = scalar_lea.vmem [#allocation5], %s609_s24 }
  0x30   : > { %s135_s22 = sshll.u32 %s127_s19, 4  ;;  %p1013_p11 = pnand %p716_p6, %p56_p8  ;;  %s1017_s22 = int_to_ptr.vmem [resolvable:$true] %s135_s22 }
  0x31   : > { %s1019_s28 = scalar_lea.sflag [#allocation6], %s123_s18  ;;  %s784_s29 = scalar_lea.hbm %s1011_s27, 1024 }
  0x32   : > { %p785_p13 = scmp.ne.s32.totalorder %s1011_s27, %s784_s29  ;;  %p786_p0 = pneg %p1013_p11 }
  0x33   : > { %s789_s6 = scalar_lea.hbm %s1136_s1, 2048  ;;  %p790_p7 = scmp.lt.u32.totalorder %s1011_s27, %s1136_s1 }
  0x34   : > { %p787_p3 = pnand %p786_p0, %p785_p13  ;;  %p791_p9 = scmp.lt.u32.totalorder %s789_s6, %s784_s29 }
  0x35   : > { %p793_p2 = scmp.lt.u32.totalorder %s784_s29, %s1011_s27 }
  0x36   : > { %p788_p5 = pneg %p787_p3  ;;  %p792_p1 = por %p791_p9, %p790_p7 }
  0x38   : > { %p794_p4 = por %p793_p2, %p792_p1 }
  0x3a   : > { %p795_p6 = pnand %p794_p4, %p788_p5 }
  0x3c   : > { %798 = shalt.err (!%p795_p6)
}
  0x3d   : > { %s799_s18 = scalar_lea.vmem %s1017_s22, 1024  ;;  %s889_s24 = smov [#allocation5]  }
  0x3e   : > { %p800_p8 = scmp.ne.s32.totalorder %s1017_s22, %s799_s18  ;;  %s804_s25 = sshll.u32 %s889_s24, 4  ;;  %s805_s25 = int_to_ptr.vmem [resolvable:$false] %s804_s25 }
  0x3f   : > { %s806_s26 = scalar_lea.vmem %s805_s25, 2048  ;;  %p807_p3 = scmp.lt.s32.totalorder %s1017_s22, %s805_s25 }
  0x40   : > { %p802_p10 = pnand %p800_p8, %p786_p0  ;;  %p808_p7 = scmp.lt.s32.totalorder %s806_s26, %s799_s18 }
  0x42   : > { %p803_p13 = pneg %p802_p10  ;;  %p809_p9 = por %p808_p7, %p807_p3 }
  0x44   : > { %p810_p1 = pnand %p809_p9, %p803_p13 }
  0x46   : > { %813 = shalt.err (!%p810_p1)
}
  0x47   : > { %710 = dma.hbm_to_vmem [thread:$0]  (!%p1013_p11), %s1011_s27, 1024, %s1017_s22, %s1019_s28, %s887_s4, %s887_s4, %s888_s5  }
  0x48   : > { %p1148_p0 = scmp.ne.s32.totalorder %s1143_s17, 0 }
  0x49   : > { %p1149_p5 = scmp.eq.s32.totalorder (!%p1148_p0), %s929_s13, 0 }
  0x4a   : > { %147 = sbr.rel (%p1148_p0) target bundleno = 326 (0x146), region = 28 }
  0x51   : > { %859 = dma.done.wait (%p1149_p5), [#allocation3], 256   ;;  %p1150_p2 = pmov %p1149_p5 }
  0x52   : > { %s1057_s19 = sand.u32 1, %s876_s10   ;;  %p1151_p11 = scmp.ne.s32.totalorder %s1141_s15, 0 }
  0x53   : > { %861 = vsyncadd (%p1150_p2), [#allocation3], 4294967040  ;;  %s615_s23 = sshll.u32 %s1057_s19, 6  ;;  %s154_s29 = scalar_lea.sflag [#allocation6], %s1057_s19 }
  0x54   : > { %s157_s4 = scalar_lea.vmem [#allocation5], %s615_s23 }
  0x55   : > { %863 = dma.done.wait (%p1151_p11), %s154_s29, 1024  }
  0x56   : > { %865 = vsyncadd (%p1151_p11), %s154_s29, 4294966272  ;;  %vm190_vm0 = vcmask 130048   ;;  %v182_v0 = vld [vmem:[%s157_s4] sm:$0xff]  ;;  %v183_v1 = vld [vmem:[%s157_s4 + $0x8] sm:$0xff]  ;;  %s177_s15 = scalar_lea.vmem [#allocation7], %s615_s23  ;;  %s634_s5 = sshll.u32 %s929_s13, 10 }
  0x57   : > { %v184_v2 = vld [vmem:[%s157_s4 + $0x10] sm:$0xff]  ;;  %v679_v3 = vpack.c.bf16 %v183_v1, %v182_v0  ;;  %v185_v4 = vld [vmem:[%s157_s4 + $0x18] sm:$0xff]  ;;  %v186_v7 = vld [vmem:[%s157_s4 + $0x20] sm:$0xff]  ;;  %s520_s17 = sshll.u32 %s177_s15, 4  ;;  %s1087_s28 = scalar_lea.hbm %s1137_s2, %s634_s5  ;;  %s1081_s17 = int_to_ptr.vmem [resolvable:$true] %s520_s17 }
  0x58   : > { %v180_v5 = vld [vmem:[#allocation2] sm:$0xff]  ;;  %v683_v6 = vpack.c.bf16 %v185_v4, %v184_v2  ;;  %v187_v8 = vld [vmem:[%s157_s4 + $0x28] sm:$0xff]  ;;  %v189_v11 = vld [vmem:[%s157_s4 + $0x38] sm:$0xff]  ;;  %s506_s13 = scalar_lea.sflag [#allocation4], %s1057_s19  ;;  %s814_s30 = scalar_lea.vmem %s1081_s17, 1024 }
  0x59   : > { %655 = vmatprep.mubr.msk.f32.mxu0 %vm190_vm0, %v180_v5  ;;  %662 = vmatprep.mubr.msk.f32.mxu1 %vm190_vm0, %v180_v5  ;;  %v188_v9 = vld [vmem:[%s157_s4 + $0x30] sm:$0xff]  ;;  %v687_v10 = vpack.c.bf16 %v187_v8, %v186_v7  ;;  %v181_v12 = vld [vmem:[#allocation2 + $0x8] sm:$0xff]  ;;  %p815_p4 = scmp.ne.s32.totalorder %s1081_s17, %s814_s30  ;;  %s890_s3 = smov [#allocation7]  }
  0x5a   : > { %680 = vmatprep.subr.bf16.mxu0 %v679_v3  ;;  %684 = vmatprep.subr.bf16.mxu1 %v683_v6  ;;  %v691_v13 = vpack.c.bf16 %v189_v11, %v188_v9  ;;  %s818_s6 = sshll.u32 %s890_s3, 4  ;;  %s819_s6 = int_to_ptr.vmem [resolvable:$false] %s818_s6 }
  0x5b   : > { %682 = vmatpush3.bf16.msra.mxu0 %v679_v3  ;;  %686 = vmatpush3.bf16.msra.mxu1 %v683_v6  ;;  %p816_p6 = pnand %p815_p4, %p1002_p12  ;;  %s820_s7 = scalar_lea.vmem %s819_s6, 2048 }
  0x5c   : > { %688 = vmatprep.subr.bf16.mxu0 %v687_v10  ;;  %692 = vmatprep.subr.bf16.mxu1 %v691_v13  ;;  %p821_p10 = scmp.lt.s32.totalorder %s1081_s17, %s819_s6  ;;  %p822_p13 = scmp.lt.s32.totalorder %s820_s7, %s814_s30 }
  0x5d   : > { %p817_p8 = pneg %p816_p6 }
  0x5e   : > { %656 = vmatmul.mubr.msk.f32.vlgmr.msra.gmra.mrb[0].mxu0 %vm190_vm0, %v181_v12  ;;  %663 = vmatmul.mubr.msk.f32.vlgmr.msra.gmra.mrb[0].mxu1 %vm190_vm0, %v181_v12  ;;  %p823_p3 = por %p822_p13, %p821_p10 }
  0x5f   : > { %690 = vmatpush3.bf16.msra.mxu0 %v687_v10  ;;  %694 = vmatpush3.bf16.msra.mxu1 %v691_v13 }
  0x60   : > { %669 = vmatprep.mubr.msk.f32.mxu0 %vm190_vm0, %v180_v5  ;;  %676 = vmatprep.mubr.msk.f32.mxu1 %vm190_vm0, %v180_v5  ;;  %p824_p7 = pnand %p823_p3, %p817_p8 }
  0x62   : > { %670 = vmatmul.mubr.msk.f32.vlgmr.msra.gmra.mrb[2].mxu0 %vm190_vm0, %v181_v12  ;;  %677 = vmatmul.mubr.msk.f32.vlgmr.msra.gmra.mrb[2].mxu1 %vm190_vm0, %v181_v12 }
 0x131   : > { %v657_v14 = vpop.f32.mrb[0].mxu0  ;;  %v664_v15 = vpop.f32.mrb[0].mxu1 }
 0x132   : > { %498 = vst.msk [vmem:[%s177_s15 + $0x8] sm:$0xff] %vm190_vm0, %v657_v14  ;;  %v263_v16 = vpop.f32.mrb[1].mxu0  ;;  %500 = vst.msk [vmem:[%s177_s15 + $0x18] sm:$0xff] %vm190_vm0, %v664_v15  ;;  %v338_v17 = vpop.f32.mrb[1].mxu1 }
 0x133   : > { %497 = vst.msk [vmem:[%s177_s15] sm:$0xff] %vm190_vm0, %v263_v16  ;;  %499 = vst.msk [vmem:[%s177_s15 + $0x10] sm:$0xff] %vm190_vm0, %v338_v17 }
 0x135   : > { %v671_v18 = vpop.f32.mrb[2].mxu0  ;;  %v678_v19 = vpop.f32.mrb[2].mxu1 }
 0x136   : > { %502 = vst.msk [vmem:[%s177_s15 + $0x28] sm:$0xff] %vm190_vm0, %v671_v18  ;;  %v413_v20 = vpop.f32.mrb[3].mxu0  ;;  %504 = vst.msk [vmem:[%s177_s15 + $0x38] sm:$0xff] %vm190_vm0, %v678_v19  ;;  %v488_v21 = vpop.f32.mrb[3].mxu1 }
 0x137   : > { %501 = vst.msk [vmem:[%s177_s15 + $0x20] sm:$0xff] %vm190_vm0, %v413_v20  ;;  %503 = vst.msk [vmem:[%s177_s15 + $0x30] sm:$0xff] %vm190_vm0, %v488_v21 }
 0x138   : > { %827 = shalt.err (!%p824_p7)
}
 0x139   : > { %s828_s20 = scalar_lea.hbm %s1087_s28, 1024  ;;  %s832_s25 = scalar_lea.hbm %s1137_s2, 2048 }
 0x13a   : > { %p829_p9 = scmp.ne.s32.totalorder %s1087_s28, %s828_s20  ;;  %p833_p5 = scmp.lt.u32.totalorder %s1087_s28, %s1137_s2 }
 0x13b   : > { %p834_p2 = scmp.lt.u32.totalorder %s832_s25, %s828_s20  ;;  %p836_p4 = scmp.lt.u32.totalorder %s828_s20, %s1087_s28 }
 0x13c   : > { %p830_p1 = pnand %p829_p9, %p1002_p12 }
 0x13d   : > { %p835_p11 = por %p834_p2, %p833_p5 }
 0x13e   : > { %p831_p0 = pneg %p830_p1 }
 0x13f   : > { %p837_p6 = por %p836_p4, %p835_p11 }
 0x141   : > { %p838_p8 = pnand %p837_p6, %p831_p0 }
 0x143   : > { %841 = shalt.err (!%p838_p8)
}
 0x144   : > { %s891_s29 = smov 128   ;;  %s892_s4 = smov 8  }
 0x145   : > { %701 = dma.vmem_to_hbm [thread:$0]  (%p1002_p12), %s1081_s17, 1024, %s1087_s28, %s506_s13, %s891_s29, %s891_s29, %s892_s4  }
 0x146 PF: > { %s535_s15 = sand.u32 1, %s872_s9   ;;  %p1152_p10 = scmp.ne.s32.totalorder %s1142_s16, 0 }
 0x147   : > { %p1153_p13 = scmp.ge.s32.totalorder %s884_s12, 2  ;;  %s536_s5 = scalar_lea.sflag [#allocation4], %s535_s15 }
 0x149   : > { %p712_p3 = pnand %p1153_p13, %p1152_p10 }
 0x14b   : > { %867 = dma.done.wait (!%p712_p3), %s536_s5, 1024  }
 0x14c   : > { %869 = vsyncadd (!%p712_p3), %s536_s5, 4294966272  ;;  %p16_p7 = scmp.ge.s32.totalorder %s964_s21, 4   ;;  %s1154_s9 = smov %s876_s10 }
 0x14d   : > { %s1155_s10 = smov %s880_s11  ;;  %s1156_s11 = smov %s998_s8 }
 0x14e   : > { %s1157_s12 = smov %s964_s21  ;;  %18 = sbr.rel (!%p16_p7) target bundleno = 6 (0x6), region = 78 }
 0x155   :  { %541 = vsyncpa [#allocation3], 1 }
 0x156   :  { %543 = vsyncpa [#allocation3 + $0x1], 1 }
 0x157   :  { %544 = vsyncpa [#allocation6], 1 }
 0x158   :  { %546 = vsyncpa [#allocation6 + $0x1], 1 }
 0x159   :  { %547 = vsyncpa [#allocation4], 1 }
 0x15a   :  { %549 = vsyncpa [#allocation4 + $0x1], 1 }

</bundles_post_ra>
